<compile_context>
chip_gen: v5e
topology: v5e:2x2
jax: 0.10.0
libtpu: 0.0.40
codegen_flags: <defaults>
</compile_context>

<pallas_src>
import functools

import numpy as np
import jax
import jax.numpy as jnp
from jax.experimental import pallas as pl
from jax.experimental.pallas import tpu as pltpu


# ----------------------------- schedule buffers ------------------------------

def make_schedule_buffers(timesteps, linear_start, linear_end):
    # make_beta_schedule("linear", ...) + register_schedule buffers (host precompute,
    # exactly like the PyTorch register_buffer tensors).
    betas = np.linspace(linear_start ** 0.5, linear_end ** 0.5, timesteps,
                        dtype=np.float64) ** 2
    alphas = 1.0 - betas
    alphas_cumprod = np.cumprod(alphas, axis=0)
    return {
        "sqrt_alphas_cumprod":
            jnp.asarray(np.sqrt(alphas_cumprod), dtype=jnp.float32),
        "sqrt_one_minus_alphas_cumprod":
            jnp.asarray(np.sqrt(1.0 - alphas_cumprod), dtype=jnp.float32),
    }


def nearest_select_matrix(in_size, out_size):
    # 0/1 selection matrix reproducing F.interpolate(mode="nearest"):
    # src = floor(dst * in/out); row `dst` selects column `src`.
    src = np.minimum((np.arange(out_size) * in_size) // out_size, in_size - 1)
    m = np.zeros((out_size, in_size), dtype=np.float32)
    m[np.arange(out_size), src] = 1.0
    return m


# ------------------------------- Pallas kernel -------------------------------

def _lowscale_kernel(coef_ref,    # (1, 1, 2)       per-batch [sqrt_ac, sqrt_1m_ac]
                     mom_ref,     # (1, 2*C*h, w)   mean || logvar slab
                     eps_ref,     # (1, C*h, w)     posterior-sample noise
                     noise_ref,   # (1, C*h, w)     q_sample noise
                     wc_ref,      # (w, out_w)      column selection (nearest)
                     wr_ref,      # (C*out_h, C*h)  block-diag row selection (nearest)
                     o_ref,       # (1, C*out_h, out_w)
                     *, ch_rows, scale_factor):
    # DiagonalGaussianDistribution.sample()
    mean = mom_ref[0, 0:ch_rows, :]
    logvar = jnp.clip(mom_ref[0, ch_rows:2 * ch_rows, :], -30.0, 20.0)
    std = jnp.exp(0.5 * logvar)
    z = (mean + std * eps_ref[0]) * scale_factor          # z * self.scale_factor

    # q_sample: per-batch scalars broadcast on the VPU (extract_into_tensor).
    a = coef_ref[0, :, 0:1]                                # (1, 1)
    s = coef_ref[0, :, 1:2]                                # (1, 1)
    z = a * z + s * noise_ref[0]

    # nearest-neighbour interpolate to (out_h, out_w): two 0/1 selection matmuls (MXU),
    # no in-kernel gather, output store stays a dense (C*out_h, out_w) slab.
    zc = jnp.dot(z, wc_ref[...], preferred_element_type=jnp.float32)      # (C*h, out_w)
    zu = jnp.dot(wr_ref[...], zc, preferred_element_type=jnp.float32)     # (C*out_h, out_w)

    o_ref[0, :, :] = zu.astype(o_ref.dtype)


def low_scale_augment(moments, noise_level, eps, noise, buffers,
                      out_size, scale_factor):
    """Everything in LowScaleEncoder.forward downstream of self.model.encode(x).

    moments:     (B, 2*C, h, w) posterior parameters (mean || logvar)
    noise_level: (B,) int32 in [0, max_noise_level)
    eps, noise:  (B, C, h, w) standard-normal draws (randn_like equivalents)
    returns:     (z_aug (B, C, out_size, out_size), noise_level)
    """
    B, two_c, h, w = moments.shape
    C = two_c // 2
    assert eps.shape == (B, C, h, w) and noise.shape == (B, C, h, w)

    # per-batch q_sample coefficients (what extract_into_tensor gathers)
    coef = jnp.stack(
        [buffers["sqrt_alphas_cumprod"][noise_level],
         buffers["sqrt_one_minus_alphas_cumprod"][noise_level]],
        axis=-1,
    ).astype(jnp.float32).reshape(B, 1, 2)

    # nearest-neighbour selection matrices (host constants)
    wc = jnp.asarray(nearest_select_matrix(w, out_size).T)                 # (w, out)
    wr = jnp.asarray(np.kron(np.eye(C, dtype=np.float32),
                             nearest_select_matrix(h, out_size)))          # (C*out, C*h)

    # flatten (C, h) into the sublane axis: pure reshapes, no data movement
    mom3 = moments.reshape(B, two_c * h, w)
    eps3 = eps.reshape(B, C * h, w)
    noi3 = noise.reshape(B, C * h, w)

    out_rows = C * out_size
    kernel = functools.partial(_lowscale_kernel, ch_rows=C * h,
                               scale_factor=float(scale_factor))

    z3 = pl.pallas_call(
        kernel,
        out_shape=jax.ShapeDtypeStruct((B, out_rows, out_size), jnp.float32),
        grid=(B,),
        in_specs=[
            pl.BlockSpec((1, 1, 2),          lambda b: (b, 0, 0)),   # coef
            pl.BlockSpec((1, two_c * h, w),  lambda b: (b, 0, 0)),   # moments
            pl.BlockSpec((1, C * h, w),      lambda b: (b, 0, 0)),   # eps
            pl.BlockSpec((1, C * h, w),      lambda b: (b, 0, 0)),   # noise
            pl.BlockSpec((w, out_size),      lambda b: (0, 0)),      # wc (resident)
            pl.BlockSpec((out_rows, C * h),  lambda b: (0, 0)),      # wr (resident)
        ],
        out_specs=pl.BlockSpec((1, out_rows, out_size), lambda b: (b, 0, 0)),
        compiler_params=pltpu.CompilerParams(
            dimension_semantics=("parallel",),      # batch axis shards across v7x cores
        ),
    )(coef, mom3, eps3, noi3, wc, wr)

    return z3.reshape(B, C, out_size, out_size), noise_level


# ---------------------------- pure-JAX reference -----------------------------

def _reference(moments, noise_level, eps, noise, buffers, out_size, scale_factor):
    C = moments.shape[1] // 2
    mean = moments[:, :C]
    logvar = jnp.clip(moments[:, C:], -30.0, 20.0)
    z = (mean + jnp.exp(0.5 * logvar) * eps) * scale_factor
    a = buffers["sqrt_alphas_cumprod"][noise_level][:, None, None, None]
    s = buffers["sqrt_one_minus_alphas_cumprod"][noise_level][:, None, None, None]
    z = a * z + s * noise
    h, w = z.shape[-2:]
    ri = jnp.minimum((jnp.arange(out_size) * h) // out_size, h - 1)
    ci = jnp.minimum((jnp.arange(out_size) * w) // out_size, w - 1)
    return z[:, :, ri, :][:, :, :, ci]


# ----------------------------------- main ------------------------------------

if __name__ == "__main__":
    # Small demo config (SD x4-upscaler style numbers scaled down).
    timesteps, linear_start, linear_end = 1000, 1e-4, 2e-2
    max_noise_level = 250
    out_size = 16
    scale_factor = 0.18215
    B, z_ch, h, w = 2, 4, 8, 8

    buffers = make_schedule_buffers(timesteps, linear_start, linear_end)

    key = jax.random.PRNGKey(0)
    k_mom, k_t, k_eps, k_noise = jax.random.split(key, 4)

    # TODO(synk): stands in for self.model.encode(x) — the AutoencoderKL comes from
    #             instantiate_from_config(model_config) and is not part of this module.
    moments = jax.random.normal(k_mom, (B, 2 * z_ch, h, w), dtype=jnp.float32)

    # torch.randint / torch.randn_like equivalents (the module draws these in forward).
    noise_level = jax.random.randint(k_t, (B,), 0, max_noise_level, dtype=jnp.int32)
    eps = jax.random.normal(k_eps, (B, z_ch, h, w), dtype=jnp.float32)
    noise = jax.random.normal(k_noise, (B, z_ch, h, w), dtype=jnp.float32)

    z, t_out = low_scale_augment(moments, noise_level, eps, noise, buffers,
                                 out_size, scale_factor)
    z = jax.block_until_ready(z)

    assert z.shape == (B, z_ch, out_size, out_size), z.shape
    assert z.dtype == jnp.float32
    assert t_out.shape == (B,) and t_out.dtype == jnp.int32
    assert bool(jnp.all(jnp.isfinite(z)))

    ref = _reference(moments, noise_level, eps, noise, buffers, out_size, scale_factor)
    assert bool(jnp.allclose(z, ref, rtol=1e-5, atol=1e-5)), \
        float(jnp.max(jnp.abs(z - ref)))

    print("KERNEL_OK")
</pallas_src>

<mosaic_0001>
module attributes {stable_mosaic.version = 11 : i64} {
  func.func @_lowscale_kernel(%arg0: i32, %arg1: memref<1x1x2xf32, #tpu.memory_space<vmem>>, %arg2: memref<1x64x8xf32, #tpu.memory_space<vmem>>, %arg3: memref<1x32x8xf32, #tpu.memory_space<vmem>>, %arg4: memref<1x32x8xf32, #tpu.memory_space<vmem>>, %arg5: memref<8x16xf32, #tpu.memory_space<vmem>>, %arg6: memref<64x32xf32, #tpu.memory_space<vmem>>, %arg7: memref<1x64x16xf32, #tpu.memory_space<vmem>>) attributes {dimension_semantics = [#tpu.dimension_semantics<parallel>], iteration_bounds = array<i64: 2>, scalar_prefetch = 0 : i64, scratch_operands = 0 : i64, tpu.core_type = #tpu.core_type<tc>, window_params = [{transform_indices = @transform_0, window_bounds = array<i64: 1, 1, 2>}, {transform_indices = @transform_1, window_bounds = array<i64: 1, 64, 8>}, {transform_indices = @transform_2, window_bounds = array<i64: 1, 32, 8>}, {transform_indices = @transform_3, window_bounds = array<i64: 1, 32, 8>}, {pipeline_mode = #tpu.pipeline_mode<synchronous>, transform_indices = @transform_4, window_bounds = array<i64: 8, 16>}, {pipeline_mode = #tpu.pipeline_mode<synchronous>, transform_indices = @transform_5, window_bounds = array<i64: 64, 32>}, {transform_indices = @transform_6, window_bounds = array<i64: 1, 64, 16>}]} {
    %c0 = arith.constant 0 : index
    %c0_0 = arith.constant 0 : index
    %c0_1 = arith.constant 0 : index
    %0 = vector.load %arg2[%c0, %c0_0, %c0_1] : memref<1x64x8xf32, #tpu.memory_space<vmem>>, vector<1x32x8xf32>
    %1 = vector.shape_cast %0 : vector<1x32x8xf32> to vector<32x8xf32>
    %c0_2 = arith.constant 0 : index
    %c32 = arith.constant 32 : index
    %c0_3 = arith.constant 0 : index
    %2 = vector.load %arg2[%c0_2, %c32, %c0_3] : memref<1x64x8xf32, #tpu.memory_space<vmem>>, vector<1x32x8xf32>
    %3 = vector.shape_cast %2 : vector<1x32x8xf32> to vector<32x8xf32>
    %cst = arith.constant -3.000000e+01 : f32
    %cst_4 = arith.constant 2.000000e+01 : f32
    %4 = vector.broadcast %cst : f32 to vector<32x8xf32>
    %5 = arith.maximumf %4, %3 : vector<32x8xf32>
    %6 = vector.broadcast %cst_4 : f32 to vector<32x8xf32>
    %7 = arith.minimumf %6, %5 : vector<32x8xf32>
    %cst_5 = arith.constant 5.000000e-01 : f32
    %8 = vector.broadcast %cst_5 : f32 to vector<32x8xf32>
    %9 = arith.mulf %8, %7 : vector<32x8xf32>
    %10 = math.exp %9 : vector<32x8xf32>
    %c0_6 = arith.constant 0 : index
    %c0_7 = arith.constant 0 : index
    %c0_8 = arith.constant 0 : index
    %11 = vector.load %arg3[%c0_6, %c0_7, %c0_8] : memref<1x32x8xf32, #tpu.memory_space<vmem>>, vector<1x32x8xf32>
    %12 = vector.shape_cast %11 : vector<1x32x8xf32> to vector<32x8xf32>
    %13 = arith.mulf %10, %12 : vector<32x8xf32>
    %14 = arith.addf %1, %13 : vector<32x8xf32>
    %cst_9 = arith.constant 1.821500e-01 : f32
    %15 = vector.broadcast %cst_9 : f32 to vector<32x8xf32>
    %16 = arith.mulf %14, %15 : vector<32x8xf32>
    %c0_10 = arith.constant 0 : index
    %c0_11 = arith.constant 0 : index
    %c0_12 = arith.constant 0 : index
    %17 = vector.load %arg1[%c0_10, %c0_11, %c0_12] : memref<1x1x2xf32, #tpu.memory_space<vmem>>, vector<1x1x1xf32>
    %18 = vector.shape_cast %17 : vector<1x1x1xf32> to vector<1x1xf32>
    %c0_13 = arith.constant 0 : index
    %c0_14 = arith.constant 0 : index
    %c1 = arith.constant 1 : index
    %19 = vector.load %arg1[%c0_13, %c0_14, %c1] : memref<1x1x2xf32, #tpu.memory_space<vmem>>, vector<1x1x1xf32>
    %20 = vector.shape_cast %19 : vector<1x1x1xf32> to vector<1x1xf32>
    %21 = vector.broadcast %18 : vector<1x1xf32> to vector<32x8xf32>
    %22 = arith.mulf %21, %16 : vector<32x8xf32>
    %c0_15 = arith.constant 0 : index
    %c0_16 = arith.constant 0 : index
    %c0_17 = arith.constant 0 : index
    %23 = vector.load %arg4[%c0_15, %c0_16, %c0_17] : memref<1x32x8xf32, #tpu.memory_space<vmem>>, vector<1x32x8xf32>
    %24 = vector.shape_cast %23 : vector<1x32x8xf32> to vector<32x8xf32>
    %25 = vector.broadcast %20 : vector<1x1xf32> to vector<32x8xf32>
    %26 = arith.mulf %25, %24 : vector<32x8xf32>
    %27 = arith.addf %22, %26 : vector<32x8xf32>
    %c0_18 = arith.constant 0 : index
    %c0_19 = arith.constant 0 : index
    %28 = vector.load %arg5[%c0_18, %c0_19] : memref<8x16xf32, #tpu.memory_space<vmem>>, vector<8x16xf32>
    %cst_20 = arith.constant dense<0.000000e+00> : vector<32x16xf32>
    %29 = tpu.matmul %27, %28, %cst_20 {dimension_numbers = #tpu.dot_dimension_numbers<[1], [0], [0], [1], [0, 0, 1, 1], [], []>} : vector<32x8xf32>, vector<8x16xf32>, vector<32x16xf32> -> vector<32x16xf32>
    %c0_21 = arith.constant 0 : index
    %c0_22 = arith.constant 0 : index
    %30 = vector.load %arg6[%c0_21, %c0_22] : memref<64x32xf32, #tpu.memory_space<vmem>>, vector<64x32xf32>
    %cst_23 = arith.constant dense<0.000000e+00> : vector<64x16xf32>
    %31 = tpu.matmul %30, %29, %cst_23 {dimension_numbers = #tpu.dot_dimension_numbers<[1], [0], [0], [1], [0, 0, 1, 1], [], []>} : vector<64x32xf32>, vector<32x16xf32>, vector<64x16xf32> -> vector<64x16xf32>
    %c0_24 = arith.constant 0 : index
    %c0_25 = arith.constant 0 : index
    %c0_26 = arith.constant 0 : index
    %32 = vector.load %arg7[%c0_24, %c0_25, %c0_26] : memref<1x64x16xf32, #tpu.memory_space<vmem>>, vector<1x64x16xf32>
    %33 = vector.shape_cast %32 : vector<1x64x16xf32> to vector<64x16xf32>
    %34 = vector.shape_cast %31 : vector<64x16xf32> to vector<1x64x16xf32>
    tpu.vector_store %arg7[%c0_24, %c0_25, %c0_26], %34 {strides = array<i32>} : memref<1x64x16xf32, #tpu.memory_space<vmem>>, vector<1x64x16xf32>,
    return
  }
  func.func @transform_0(%arg0: i32) -> (i32, i32, i32) {
    %c0_i32 = arith.constant 0 : i32
    %c0_i32_0 = arith.constant 0 : i32
    %c0_i32_1 = arith.constant 0 : i32
    return %arg0, %c0_i32, %c0_i32_0 : i32, i32, i32
  }
  func.func @transform_1(%arg0: i32) -> (i32, i32, i32) {
    %c0_i32 = arith.constant 0 : i32
    %c0_i32_0 = arith.constant 0 : i32
    %c0_i32_1 = arith.constant 0 : i32
    return %arg0, %c0_i32, %c0_i32_0 : i32, i32, i32
  }
  func.func @transform_2(%arg0: i32) -> (i32, i32, i32) {
    %c0_i32 = arith.constant 0 : i32
    %c0_i32_0 = arith.constant 0 : i32
    %c0_i32_1 = arith.constant 0 : i32
    return %arg0, %c0_i32, %c0_i32_0 : i32, i32, i32
  }
  func.func @transform_3(%arg0: i32) -> (i32, i32, i32) {
    %c0_i32 = arith.constant 0 : i32
    %c0_i32_0 = arith.constant 0 : i32
    %c0_i32_1 = arith.constant 0 : i32
    return %arg0, %c0_i32, %c0_i32_0 : i32, i32, i32
  }
  func.func @transform_4(%arg0: i32) -> (i32, i32) {
    %c0_i32 = arith.constant 0 : i32
    %c0_i32_0 = arith.constant 0 : i32
    %c0_i32_1 = arith.constant 0 : i32
    return %c0_i32, %c0_i32_0 : i32, i32
  }
  func.func @transform_5(%arg0: i32) -> (i32, i32) {
    %c0_i32 = arith.constant 0 : i32
    %c0_i32_0 = arith.constant 0 : i32
    %c0_i32_1 = arith.constant 0 : i32
    return %c0_i32, %c0_i32_0 : i32, i32
  }
  func.func @transform_6(%arg0: i32) -> (i32, i32, i32) {
    %c0_i32 = arith.constant 0 : i32
    %c0_i32_0 = arith.constant 0 : i32
    %c0_i32_1 = arith.constant 0 : i32
    return %arg0, %c0_i32, %c0_i32_0 : i32, i32, i32
  }
}

</mosaic_0001>

<bundles_post_ra>
// kernel: tpu_custom_call.1
= control target key start
LH: loop header
LB: loop body
LE: loop exit
PB: predicated region body
PF: predicated region fallthrough
CT: control target
= control target key end

     0   :  { %s696_s21 = smov 0   ;;  %s800_s0 = inlined_call_operand.vmem [shape: f32[2,1,2], index: 0, kind: input, shape index: {}]   ;;  %s801_s1 = inlined_call_operand.vmem [shape: f32[2,64,8], index: 1, kind: input, shape index: {}]   ;;  %s802_s2 = inlined_call_operand.vmem [shape: f32[2,32,8], index: 2, kind: input, shape index: {}]   ;;  %s803_s3 = inlined_call_operand.vmem [shape: f32[2,32,8], index: 3, kind: input, shape index: {}]   ;;  %s804_s4 = inlined_call_operand.vmem [shape: f32[8,16], index: 4, kind: input, shape index: {}]   ;;  %s805_s5 = inlined_call_operand.vmem [shape: f32[64,32], index: 5, kind: input, shape index: {}]   ;;  %s806_s6 = inlined_call_operand.vmem [shape: f32[2,64,16], index: 6, kind: output, shape index: {}]  }
   0x1 LB: > { %s591_s22 = sadd.s32 4294967295, %s657_s21   ;;  %p595_p0 = scmp.ge.s32.totalorder %s657_s21, 1  ;;  %s657_s21 = sphi %s696_s21, %s16_s21  }
   0x2   : > { %p240_p1 = scmp.lt.s32.totalorder %s657_s21, 3 }
   0x4   : > { %p241_p2 = pnand %p595_p0, %p240_p1 }
   0x5   : > { %p283_p3 = scmp.lt.s32.totalorder (!%p241_p2), %s591_s22, 1 }
   0x6   : > { %244 = sbr.rel (%p241_p2) target bundleno = 448 (0x1c0), region = 44 }
   0xb   : > { %v659_v0 = vmov 0   ;;  %s808_s22 = smov (!%p283_p3, %s591_s22), 1  ;;  %v660_v2 = vmov 1   ;;  %v377_v7 = vld [vmem:[%s804_s4] sm:$0xff]  ;;  %vm378_vm0 = vcmask 64512   ;;  %vm428_vm1 = vcmask 261120  }
   0xc   : > { %640 = vset.pattern.permute.xlu0 %v659_v0  ;;  %s285_s25 = scalar_lea.vmem %s800_s0, %s808_s22  ;;  %s618_s26 = sshll.u32 %s808_s22, 6  ;;  %406 = vmatpush.msra.mxu0 %v377_v7  ;;  %v420_v7 = vld [vmem:[%s805_s5] sm:$0xff]  ;;  %vm494_vm2 = vcmask 130048  }
   0xd   : > { %v642_v1 = vld [vmem:[%s285_s25] ss:$0 sm:$0xff]  ;;  %s716_s29 = scalar_lea.vmem %s801_s1, %s618_s26  ;;  %s619_s8 = sshll.u32 %s808_s22, 5 }
   0xe   : > { %354 = vperm.xlu0 %640, %v642_v1   ;;  %v310_v3 = vld [vmem:[%s716_s29 + $0x20] sm:$0xff]  ;;  %v311_v6 = vld [vmem:[%s716_s29 + $0x28] sm:$0xff]  ;;  %v312_v12 = vld [vmem:[%s716_s29 + $0x30] sm:$0xff]  ;;  %s728_s11 = scalar_lea.vmem %s802_s2, %s619_s8  ;;  %s737_s14 = scalar_lea.vmem %s803_s3, %s619_s8 }
   0xf   : > { %v314_v4 = vmax.f32 %v310_v3, -30.0  ;;  %v315_v8 = vmax.f32 %v311_v6, -30.0  ;;  %v316_v13 = vmax.f32 %v312_v12, -30.0  ;;  %v313_v17 = vld [vmem:[%s716_s29 + $0x38] sm:$0xff]  ;;  %v334_v19 = vld [vmem:[%s728_s11] sm:$0xff]  ;;  %v335_v29 = vld [vmem:[%s728_s11 + $0x8] sm:$0xff]  ;;  %s305_s12 = scalar_lea.vmem %s806_s6, %s618_s26 }
  0x10   : > { %v317_v20 = vmax.f32 %v313_v17, -30.0  ;;  %v306_v23 = vld [vmem:[%s716_s29] sm:$0xff]  ;;  %v307_v33 = vld [vmem:[%s716_s29 + $0x8] sm:$0xff]  ;;  %v336_v41 = vld [vmem:[%s728_s11 + $0x10] sm:$0xff] }
  0x11   : > { %v318_v5 = vmin.f32 %v314_v4, 20.0  ;;  %v319_v10 = vmin.f32 %v315_v8, 20.0  ;;  %v320_v15 = vmin.f32 %v316_v13, 20.0  ;;  %v361_v34 = vld [vmem:[%s737_s14] sm:$0xff]  ;;  %v362_v43 = vld [vmem:[%s737_s14 + $0x8] sm:$0xff]  ;;  %v308_v46 = vld [vmem:[%s716_s29 + $0x10] sm:$0xff] }
  0x12   : > { %v321_v25 = vmin.f32 %v317_v20, 20.0  ;;  %v337_v51 = vld [vmem:[%s728_s11 + $0x18] sm:$0xff]  ;;  %v363_v53 = vld [vmem:[%s737_s14 + $0x10] sm:$0xff]  ;;  %v425_v12 = vld [vmem:[%s805_s5 + $0x28] sm:$0xff] }
  0x13   : > { %v322_v9 = vmul.f32 0.5, %v318_v5  ;;  %v323_v14 = vmul.f32 0.5, %v319_v10  ;;  %v324_v21 = vmul.f32 0.5, %v320_v15  ;;  %v309_v56 = vld [vmem:[%s716_s29 + $0x18] sm:$0xff]  ;;  %v426_v8 = vld [vmem:[%s805_s5 + $0x30] sm:$0xff]  ;;  %v421_v10 = vld [vmem:[%s805_s5 + $0x8] sm:$0xff] }
  0x14   : > { %v325_v30 = vmul.f32 0.5, %v321_v25  ;;  %v364_v61 = vld [vmem:[%s737_s14 + $0x18] sm:$0xff]  ;;  %v422_v13 = vld [vmem:[%s805_s5 + $0x10] sm:$0xff] }
  0x15   : > { %v326_v11 = vmul.f32 1.442695, %v322_v9  ;;  %v328_v16 = vmul.f32 1.442695, %v323_v14  ;;  %v330_v26 = vmul.f32 1.442695, %v324_v21 }
  0x16   : > { %641 = vset.pattern.permute.xlu0 %v660_v2  ;;  %v332_v35 = vmul.f32 1.442695, %v325_v30  ;;  %v423_v6 = vld [vmem:[%s805_s5 + $0x18] sm:$0xff]  ;;  %v424_v9 = vld [vmem:[%s805_s5 + $0x20] sm:$0xff] }
  0x17   : > { %366 = vperm.xlu0 %641, %v642_v1   ;;  %643 = vpow2.f32 %v326_v11  ;;  %v427_v11 = vld [vmem:[%s805_s5 + $0x38] sm:$0xff] }
  0x18   : > { %645 = vpow2.f32 %v328_v16 }
  0x19   : > { %647 = vpow2.f32 %v330_v26 }
  0x1a   : > { %649 = vpow2.f32 %v332_v35 }
  0x1d   : > { %v644_v18 = vpop.eup %643 }
  0x1e   : > { %v338_v22 = vmul.f32 %v644_v18, %v334_v19  ;;  %v646_v28 = vpop.eup %645 }
  0x1f   : > { %v339_v31 = vmul.f32 %v646_v28, %v335_v29  ;;  %v648_v40 = vpop.eup %647 }
  0x20   : > { %v342_v27 = vadd.f32 %v338_v22, %v306_v23  ;;  %v340_v44 = vmul.f32 %v648_v40, %v336_v41  ;;  %v650_v50 = vpop.eup %649 }
  0x21   : > { %v343_v37 = vadd.f32 %v339_v31, %v307_v33  ;;  %v341_v54 = vmul.f32 %v650_v50, %v337_v51 }
  0x22   : > { %v346_v32 = vmul.f32 0.18215, %v342_v27  ;;  %v344_v48 = vadd.f32 %v340_v44, %v308_v46 }
  0x23   : > { %v347_v45 = vmul.f32 0.18215, %v343_v37  ;;  %v345_v58 = vadd.f32 %v341_v54, %v309_v56 }
  0x24   : > { %v348_v55 = vmul.f32 0.18215, %v344_v48 }
  0x25   : > { %v349_v62 = vmul.f32 0.18215, %v345_v58 }
  0x80   : > { %v355_v24 = vpop.permute.xlu0 %354 }
  0x81   : > { %v357_v38 = vmul.f32 %v355_v24, %v346_v32  ;;  %v358_v49 = vmul.f32 %v355_v24, %v347_v45  ;;  %v359_v59 = vmul.f32 %v355_v24, %v348_v55  ;;  %v360_v0 = vmul.f32 %v355_v24, %v349_v62 }
  0x89   : > { %v367_v36 = vpop.permute.xlu0 %366 }
  0x8a   : > { %v369_v39 = vmul.f32 %v367_v36, %v361_v34  ;;  %v370_v47 = vmul.f32 %v367_v36, %v362_v43  ;;  %v371_v57 = vmul.f32 %v367_v36, %v363_v53  ;;  %v372_v63 = vmul.f32 %v367_v36, %v364_v61 }
  0x8c   : > { %v373_v42 = vadd.f32 %v369_v39, %v357_v38  ;;  %v374_v52 = vadd.f32 %v370_v47, %v358_v49  ;;  %v375_v60 = vadd.f32 %v371_v57, %v359_v59  ;;  %v376_v1 = vadd.f32 %v372_v63, %v360_v0 }
  0x8e   : > { %604 = vmatmul.msk.f32.vlgmr.msra.gmra.mxu0 %vm378_vm0, %v373_v42 }
  0x96   : > { %605 = vmatmul.msk.f32.gmra.mxu0 %vm378_vm0, %v374_v52 }
  0x9e   : > { %606 = vmatmul.msk.f32.gmra.mxu0 %vm378_vm0, %v375_v60 }
  0xa6   : > { %607 = vmatmul.msk.f32.gmra.mxu0 %vm378_vm0, %v376_v1 }
 0x10b   : > { %v408_v2 = vpop.f32.mrf.mxu0 }
 0x113   : > { %v411_v3 = vpop.f32.mrf.mxu0 }
 0x11b   : > { %v414_v4 = vpop.f32.mrf.mxu0 }
 0x123   : > { %v417_v5 = vpop.f32.mrf.mxu0 }
 0x124   : > { %465 = vmatpush.msra.mxu1 %v417_v5  ;;  %622 = vmatpush.msra.mxu2 %v417_v5 }
 0x125   : > { %623 = vmatpush.msra.mxu3 %v417_v5 }
 0x126   : > { %466 = vmatpush.msra.mxu1 %v414_v4  ;;  %624 = vmatpush.msra.mxu2 %v414_v4 }
 0x127   : > { %625 = vmatpush.msra.mxu3 %v414_v4 }
 0x128   : > { %467 = vmatpush.msra.mxu1 %v411_v3  ;;  %626 = vmatpush.msra.mxu2 %v411_v3 }
 0x129   : > { %627 = vmatpush.msra.mxu3 %v411_v3 }
 0x12a   : > { %468 = vmatpush.msra.mxu1 %v408_v2  ;;  %628 = vmatpush.msra.mxu2 %v408_v2 }
 0x12b   : > { %629 = vmatpush.msra.mxu3 %v408_v2  ;;  %611 = vmatmul.msk.f32.vlgmr.msra.gmra.mxu2 %vm428_vm1, %v423_v6 }
 0x12c   : > { %608 = vmatmul.msk.f32.vlgmr.msra.gmra.mxu1 %vm428_vm1, %v420_v7  ;;  %614 = vmatmul.msk.f32.vlgmr.msra.gmra.mxu3 %vm428_vm1, %v426_v8 }
 0x133   : > { %612 = vmatmul.msk.f32.gmra.mxu2 %vm428_vm1, %v424_v9 }
 0x134   : > { %609 = vmatmul.msk.f32.gmra.mxu1 %vm428_vm1, %v421_v10  ;;  %615 = vmatmul.msk.f32.gmra.mxu3 %vm428_vm1, %v427_v11 }
 0x13b   : > { %613 = vmatmul.msk.f32.gmra.mxu2 %vm428_vm1, %v425_v12 }
 0x13c   : > { %610 = vmatmul.msk.f32.gmra.mxu1 %vm428_vm1, %v422_v13 }
 0x1a9   : > { %v470_v14 = vpop.f32.mrf.mxu1 }
 0x1aa   : > { %495 = vst.msk [vmem:[%s305_s12] sm:$0xff] %vm494_vm2, %v470_v14 }
 0x1ae   : > { %v479_v15 = vpop.f32.mrf.mxu2 }
 0x1af   : > { %498 = vst.msk [vmem:[%s305_s12 + $0x18] sm:$0xff] %vm494_vm2, %v479_v15  ;;  %v488_v16 = vpop.f32.mrf.mxu3 }
 0x1b0   : > { %501 = vst.msk [vmem:[%s305_s12 + $0x30] sm:$0xff] %vm494_vm2, %v488_v16 }
 0x1b1   : > { %v473_v17 = vpop.f32.mrf.mxu1 }
 0x1b2   : > { %496 = vst.msk [vmem:[%s305_s12 + $0x8] sm:$0xff] %vm494_vm2, %v473_v17 }
 0x1b6   : > { %v482_v18 = vpop.f32.mrf.mxu2 }
 0x1b7   : > { %499 = vst.msk [vmem:[%s305_s12 + $0x20] sm:$0xff] %vm494_vm2, %v482_v18  ;;  %v491_v19 = vpop.f32.mrf.mxu3 }
 0x1b8   : > { %502 = vst.msk [vmem:[%s305_s12 + $0x38] sm:$0xff] %vm494_vm2, %v491_v19 }
 0x1b9   : > { %v476_v20 = vpop.f32.mrf.mxu1 }
 0x1ba   : > { %497 = vst.msk [vmem:[%s305_s12 + $0x10] sm:$0xff] %vm494_vm2, %v476_v20 }
 0x1be   : > { %v485_v21 = vpop.f32.mrf.mxu2 }
 0x1bf   : > { %500 = vst.msk [vmem:[%s305_s12 + $0x28] sm:$0xff] %vm494_vm2, %v485_v21 }
 0x1c0 PF: > { %s16_s21 = sadd.s32 1, %s657_s21  }
 0x1c1   : > { %p13_p4 = scmp.ge.s32.totalorder %s16_s21, 4  }
 0x1c3   :  { %15 = sbr.rel (!%p13_p4) target bundleno = 1 (0x1), region = 83 }

</bundles_post_ra>
